<compile_context>
chip_gen: v7x
topology: tpu7x:2x2x1
jax: 0.10.0
libtpu: 0.0.40
codegen_flags: <defaults>
</compile_context>

<pallas_src>
import jax
import jax.numpy as jnp
from jax.experimental import pallas as pl
from jax.experimental.pallas import tpu as pltpu


HIDDEN_PAD = 128  # hidden dim padded to a full lane width


def _round_up(n, m):
    return ((n + m - 1) // m) * m


def _orthogonal(key, rows, cols, gain=1.0, dtype=jnp.float32):
    """Deterministic orthogonal init (matches torch.nn.init.orthogonal_ semantics)."""
    a = jax.random.normal(key, (rows, cols), dtype=jnp.float32)
    transposed = rows < cols
    if transposed:
        a = a.T
    q, r = jnp.linalg.qr(a)
    d = jnp.sign(jnp.diagonal(r))
    q = q * d[None, :]
    if transposed:
        q = q.T
    return (gain * q).astype(dtype)


def classifier_kernel(x_ref, w1_ref, b1_ref, wd_ref, out_ref):
    """Fused MLP + 2-class softmax on one batch tile.

    x_ref  : (TB, 2E)   f32   -- streamed over the batch grid (cast to bf16 here)
    w1_ref : (2E, HP)   bf16  -- VMEM-resident (constant block index)
    b1_ref : (1, HP)    f32   -- VMEM-resident; b1[H] == 1.0 (bias carrier)
    wd_ref : (HP, 128)  bf16  -- VMEM-resident; col 0 = w2[0]-w2[1], wd[H,0] = b2[0]-b2[1]
    out_ref: (TB, 2)    f32
    """
    # Linear 1: cast streamed f32 activations to bf16 in-kernel (VPU), MXU matmul
    # with f32 accumulation, then f32 bias + ReLU on the VPU.
    xb = x_ref[...].astype(jnp.bfloat16)
    h = jnp.dot(xb, w1_ref[...], preferred_element_type=jnp.float32)      # (TB, HP)
    h = jnp.maximum(h + b1_ref[...], 0.0)

    # Logit difference a0 - a1. bf16 operands -> single MXU pass (v5e has no
    # native f32 MXU path); only H+1 contraction rows are nonzero so the
    # accuracy impact is negligible. b2[0]-b2[1] enters via the constant-one
    # bias-carrier hidden column.
    zf = jnp.dot(h.astype(jnp.bfloat16), wd_ref[...],
                 preferred_element_type=jnp.float32)                      # (TB, 128)
    # Clip keeps exp well-behaved, including for the unused rows of a ragged
    # last batch tile (their output rows are masked out on writeback anyway).
    z = jnp.clip(zf[:, 0:1], -60.0, 60.0)                                 # (TB, 1)

    # softmax([a0, a1]) == [sigmoid(a0-a1), 1 - sigmoid(a0-a1)]  (exact identity)
    p0 = pl.reciprocal(1.0 + jnp.exp(-z), approx=False)                   # exact

    # Single lane-broadcast + select -> one store of the (TB, 2) result.
    col = jax.lax.broadcasted_iota(jnp.int32, (p0.shape[0], 2), 1)
    out_ref[...] = jnp.where(col == 0, p0, 1.0 - p0).astype(out_ref.dtype)


def nonlinear_order_classifier(emb, w1_pt, b1_pt, w2_pt, b2_pt, *, block_b=2048):
    """Forward pass of NonlinearOrderClassifier.

    emb:   (B, 2, emb_size) float32
    w1_pt: (hidden, 2*emb_size)  -- PyTorch (out, in) layout
    b1_pt: (hidden,)
    w2_pt: (2, hidden)
    b2_pt: (2,)
    Returns (B, 2) float32 softmax probabilities.
    """
    B = emb.shape[0]
    two_e = emb.shape[1] * emb.shape[2]
    H = w1_pt.shape[0]
    HP = HIDDEN_PAD
    # TODO(synk): bias-carrier / padded-hidden scheme assumes hidden_size < 128
    # and exactly 2 output classes (true for this module).
    assert H < HP, "hidden_size must be smaller than the 128-lane pad"

    # Flatten (== nn.Flatten): contiguous reshape, metadata-only, no HBM pass.
    x = emb.reshape(B, two_e)

    # Batch tile: multiple of 8 sublanes; big enough to amortize per-grid-step
    # overhead; capped at ~ceil(B/2) so the parallel batch axis always has >= 2
    # steps (both v7x TensorCores stream). Double-buffered f32 tiles stay well
    # under the 32 MiB VMEM limit even at block_b=2048, 2E=512.
    TB = max(8, min(_round_up(block_b, 8), _round_up(pl.cdiv(B, 2), 8)))
    grid = (pl.cdiv(B, TB),)  # last block may be ragged; Pallas masks the writeback

    # --- parameter prep (one-time, tiny, outside the kernel) ---
    # W1 transposed to (in, out), hidden padded with zero columns to 128, bf16.
    w1 = jnp.zeros((two_e, HP), jnp.float32).at[:, :H].set(w1_pt.T.astype(jnp.float32))
    w1 = w1.astype(jnp.bfloat16)
    b1 = jnp.zeros((1, HP), jnp.float32).at[0, :H].set(b1_pt.astype(jnp.float32))
    b1 = b1.at[0, H].set(1.0)                    # bias-carrier unit: relu(0 + 1) = 1
    # 2-class softmax only needs the differences.
    w_diff = (w2_pt[0, :] - w2_pt[1, :]).astype(jnp.float32)    # (H,)
    b_diff = (b2_pt[0] - b2_pt[1]).astype(jnp.float32)
    wd = jnp.zeros((HP, 128), jnp.float32).at[:H, 0].set(w_diff)
    wd = wd.at[H, 0].set(b_diff).astype(jnp.bfloat16)

    cost = pl.CostEstimate(
        flops=2 * B * two_e * HP + 2 * B * HP * 128,
        transcendentals=B,
        bytes_accessed=(B * two_e * 4           # x (f32, streamed)
                        + two_e * HP * 2        # w1 (bf16, once)
                        + HP * 4                # b1
                        + HP * 128 * 2          # wd (bf16, once)
                        + B * 2 * 4),           # out
    )

    out = pl.pallas_call(
        classifier_kernel,
        out_shape=jax.ShapeDtypeStruct((B, 2), jnp.float32),
        grid_spec=pltpu.PrefetchScalarGridSpec(
            num_scalar_prefetch=0,
            grid=grid,
            in_specs=[
                pl.BlockSpec((TB, two_e), lambda i: (i, 0)),   # x: streamed batch tiles
                pl.BlockSpec((two_e, HP), lambda i: (0, 0)),   # w1: VMEM-resident
                pl.BlockSpec((1, HP), lambda i: (0, 0)),       # b1: VMEM-resident
                pl.BlockSpec((HP, 128), lambda i: (0, 0)),     # wd: VMEM-resident
            ],
            out_specs=pl.BlockSpec((TB, 2), lambda i: (i, 0)),
        ),
        compiler_params=pltpu.CompilerParams(
            dimension_semantics=("parallel",),   # shard batch tiles across TCs on v7x
            vmem_limit_bytes=32 * 1024 * 1024,
        ),
        cost_estimate=cost,
    )(x, w1, b1, wd)

    return out


if __name__ == "__main__":
    # Small, module-consistent shapes (emb_size small on purpose; PyTorch default is 256).
    emb_size = 32
    hidden_size = 4
    B = 300          # deliberately NOT a multiple of the batch tile -> exercises ragged block

    key = jax.random.PRNGKey(0)
    k_x, k_w1, k_w2, k_b1, k_b2 = jax.random.split(key, 5)

    emb = jax.random.normal(k_x, (B, 2, emb_size), dtype=jnp.float32)

    # Parameters mirroring the PyTorch init scheme (orthogonal weights; the
    # module inits biases to 0 — use small nonzero biases so the bias path is
    # exercised, since trained params are arbitrary).
    gain_relu = float(jnp.sqrt(2.0))
    w1_pt = _orthogonal(k_w1, hidden_size, 2 * emb_size, gain=gain_relu)   # (H, 2E)
    w2_pt = _orthogonal(k_w2, 2, hidden_size, gain=1.0)                    # (2, H)
    b1_pt = 0.1 * jax.random.normal(k_b1, (hidden_size,), dtype=jnp.float32)
    b2_pt = 0.1 * jax.random.normal(k_b2, (2,), dtype=jnp.float32)

    out = nonlinear_order_classifier(emb, w1_pt, b1_pt, w2_pt, b2_pt)
    out = jax.block_until_ready(out)

    HI = jax.lax.Precision.HIGHEST
    x_flat = emb.reshape(B, -1)

    # Reference 1: mirrors the kernel's exact numeric path (bf16 x/w1 on the
    # first matmul, bf16 h/wd on the second, f32 everywhere else).
    xb = x_flat.astype(jnp.bfloat16).astype(jnp.float32)
    w1b = w1_pt.T.astype(jnp.bfloat16).astype(jnp.float32)
    h_ref = jnp.maximum(jnp.dot(xb, w1b, precision=HI) + b1_pt[None, :], 0.0)
    hb = h_ref.astype(jnp.bfloat16).astype(jnp.float32)
    wdb = (w2_pt[0] - w2_pt[1]).astype(jnp.bfloat16).astype(jnp.float32)
    bdb = (b2_pt[0] - b2_pt[1]).astype(jnp.bfloat16).astype(jnp.float32)
    z_ref = jnp.dot(hb, wdb, precision=HI) + bdb
    p0_ref = 1.0 / (1.0 + jnp.exp(-z_ref))
    ref_exact = jnp.stack([p0_ref, 1.0 - p0_ref], axis=1)

    # Reference 2: full-f32 PyTorch-equivalent forward (loose sanity check on
    # the bf16 MXU rounding).
    h32 = jnp.maximum(jnp.dot(x_flat, w1_pt.T, precision=HI) + b1_pt[None, :], 0.0)
    logits32 = jnp.dot(h32, w2_pt.T, precision=HI) + b2_pt[None, :]
    ref_f32 = jax.nn.softmax(logits32, axis=1)

    assert out.shape == (B, 2)
    assert jnp.allclose(jnp.sum(out, axis=1), 1.0, atol=1e-5)
    assert jnp.allclose(out, ref_exact, atol=1e-3), (
        f"mismatch vs exact-path reference, max abs diff {jnp.max(jnp.abs(out - ref_exact))}")
    assert jnp.allclose(out, ref_f32, atol=2e-2), (
        f"mismatch vs f32 reference, max abs diff {jnp.max(jnp.abs(out - ref_f32))}")
    print("KERNEL_OK")
</pallas_src>

<mosaic_0001>
module attributes {stable_mosaic.version = 11 : i64} {
  func.func @classifier_kernel(%arg0: i32, %arg1: memref<152x64xf32, #tpu.memory_space<vmem>>, %arg2: memref<64x128xbf16, #tpu.memory_space<vmem>>, %arg3: memref<1x128xf32, #tpu.memory_space<vmem>>, %arg4: memref<128x128xbf16, #tpu.memory_space<vmem>>, %arg5: memref<152x2xf32, #tpu.memory_space<vmem>>) attributes {dimension_semantics = [#tpu.dimension_semantics<parallel>], iteration_bounds = array<i64: 2>, scalar_prefetch = 0 : i64, scratch_operands = 0 : i64, tpu.core_type = #tpu.core_type<tc>, window_params = [{transform_indices = @transform_0, window_bounds = array<i64: 152, 64>}, {pipeline_mode = #tpu.pipeline_mode<synchronous>, transform_indices = @transform_1, window_bounds = array<i64: 64, 128>}, {pipeline_mode = #tpu.pipeline_mode<synchronous>, transform_indices = @transform_2, window_bounds = array<i64: 1, 128>}, {pipeline_mode = #tpu.pipeline_mode<synchronous>, transform_indices = @transform_3, window_bounds = array<i64: 128, 128>}, {transform_indices = @transform_4, window_bounds = array<i64: 152, 2>}]} {
    %c0 = arith.constant 0 : index
    %c0_0 = arith.constant 0 : index
    %0 = vector.load %arg1[%c0, %c0_0] : memref<152x64xf32, #tpu.memory_space<vmem>>, vector<152x64xf32>
    %1 = arith.truncf %0 : vector<152x64xf32> to vector<152x64xbf16>
    %c0_1 = arith.constant 0 : index
    %c0_2 = arith.constant 0 : index
    %2 = vector.load %arg2[%c0_1, %c0_2] : memref<64x128xbf16, #tpu.memory_space<vmem>>, vector<64x128xbf16>
    %cst = arith.constant dense<0.000000e+00> : vector<152x128xf32>
    %3 = tpu.matmul %1, %2, %cst {dimension_numbers = #tpu.dot_dimension_numbers<[1], [0], [0], [1], [0, 0, 1, 1], [], []>} : vector<152x64xbf16>, vector<64x128xbf16>, vector<152x128xf32> -> vector<152x128xf32>
    %c0_3 = arith.constant 0 : index
    %c0_4 = arith.constant 0 : index
    %4 = vector.load %arg3[%c0_3, %c0_4] : memref<1x128xf32, #tpu.memory_space<vmem>>, vector<1x128xf32>
    %5 = vector.broadcast %4 : vector<1x128xf32> to vector<152x128xf32>
    %6 = arith.addf %3, %5 : vector<152x128xf32>
    %cst_5 = arith.constant 0.000000e+00 : f32
    %7 = vector.broadcast %cst_5 : f32 to vector<152x128xf32>
    %8 = arith.maximumf %6, %7 : vector<152x128xf32>
    %9 = arith.truncf %8 : vector<152x128xf32> to vector<152x128xbf16>
    %c0_6 = arith.constant 0 : index
    %c0_7 = arith.constant 0 : index
    %10 = vector.load %arg4[%c0_6, %c0_7] : memref<128x128xbf16, #tpu.memory_space<vmem>>, vector<128x128xbf16>
    %cst_8 = arith.constant dense<0.000000e+00> : vector<152x128xf32>
    %11 = tpu.matmul %9, %10, %cst_8 {dimension_numbers = #tpu.dot_dimension_numbers<[1], [0], [0], [1], [0, 0, 1, 1], [], []>} : vector<152x128xbf16>, vector<128x128xbf16>, vector<152x128xf32> -> vector<152x128xf32>
    %12 = vector.extract_strided_slice %11 {offsets = [0, 0], sizes = [152, 1], strides = [1, 1]} : vector<152x128xf32> to vector<152x1xf32>
    %cst_9 = arith.constant -6.000000e+01 : f32
    %cst_10 = arith.constant 6.000000e+01 : f32
    %13 = vector.broadcast %cst_9 : f32 to vector<152x1xf32>
    %14 = arith.maximumf %13, %12 : vector<152x1xf32>
    %15 = vector.broadcast %cst_10 : f32 to vector<152x1xf32>
    %16 = arith.minimumf %15, %14 : vector<152x1xf32>
    %cst_11 = arith.constant 0.000000e+00 : f32
    %17 = vector.broadcast %cst_11 : f32 to vector<152x1xf32>
    %18 = arith.subf %17, %16 : vector<152x1xf32>
    %19 = math.exp %18 : vector<152x1xf32>
    %cst_12 = arith.constant 1.000000e+00 : f32
    %20 = vector.broadcast %cst_12 : f32 to vector<152x1xf32>
    %21 = arith.addf %20, %19 : vector<152x1xf32>
    %22 = tpu.reciprocal %21 : vector<152x1xf32> -> vector<152x1xf32>
    %23 = tpu.iota {dimensions = array<i32: 1>} : vector<152x2xi32>
    %c0_i32 = arith.constant 0 : i32
    %24 = vector.broadcast %c0_i32 : i32 to vector<152x2xi32>
    %25 = arith.cmpi eq, %23, %24 : vector<152x2xi32>
    %cst_13 = arith.constant 1.000000e+00 : f32
    %26 = vector.broadcast %cst_13 : f32 to vector<152x1xf32>
    %27 = arith.subf %26, %22 : vector<152x1xf32>
    %28 = vector.shape_cast %22 : vector<152x1xf32> to vector<152x1xf32>
    %29 = vector.broadcast %28 : vector<152x1xf32> to vector<152x2xf32>
    %30 = vector.shape_cast %27 : vector<152x1xf32> to vector<152x1xf32>
    %31 = vector.broadcast %30 : vector<152x1xf32> to vector<152x2xf32>
    %32 = arith.select %25, %29, %31 : vector<152x2xi1>, vector<152x2xf32>
    %c0_14 = arith.constant 0 : index
    %c0_15 = arith.constant 0 : index
    %33 = vector.load %arg5[%c0_14, %c0_15] : memref<152x2xf32, #tpu.memory_space<vmem>>, vector<152x2xf32>
    tpu.vector_store %arg5[%c0_14, %c0_15], %32 {strides = array<i32>} : memref<152x2xf32, #tpu.memory_space<vmem>>, vector<152x2xf32>,
    return
  }
  func.func @transform_0(%arg0: i32) -> (i32, i32) {
    %c0_i32 = arith.constant 0 : i32
    %c0_i32_0 = arith.constant 0 : i32
    return %arg0, %c0_i32 : i32, i32
  }
  func.func @transform_1(%arg0: i32) -> (i32, i32) {
    %c0_i32 = arith.constant 0 : i32
    %c0_i32_0 = arith.constant 0 : i32
    %c0_i32_1 = arith.constant 0 : i32
    return %c0_i32, %c0_i32_0 : i32, i32
  }
  func.func @transform_2(%arg0: i32) -> (i32, i32) {
    %c0_i32 = arith.constant 0 : i32
    %c0_i32_0 = arith.constant 0 : i32
    %c0_i32_1 = arith.constant 0 : i32
    return %c0_i32, %c0_i32_0 : i32, i32
  }
  func.func @transform_3(%arg0: i32) -> (i32, i32) {
    %c0_i32 = arith.constant 0 : i32
    %c0_i32_0 = arith.constant 0 : i32
    %c0_i32_1 = arith.constant 0 : i32
    return %c0_i32, %c0_i32_0 : i32, i32
  }
  func.func @transform_4(%arg0: i32) -> (i32, i32) {
    %c0_i32 = arith.constant 0 : i32
    %c0_i32_0 = arith.constant 0 : i32
    return %arg0, %c0_i32 : i32, i32
  }
}

</mosaic_0001>

<bundles_post_ra>
// kernel: tpu_custom_call.1
= control target key start
LH: loop header
LB: loop body
LE: loop exit
PB: predicated region body
PF: predicated region fallthrough
CT: control target
= control target key end

     0   :  { %s1354_s15 = smov 0   ;;  %s1565_s0 = inlined_call_operand.vmem [shape: f32[300,64], index: 0, kind: input, shape index: {}]   ;;  %s1566_s1 = inlined_call_operand.vmem [shape: bf16[64,128], index: 1, kind: input, shape index: {}]   ;;  %s1567_s2 = inlined_call_operand.vmem [shape: f32[1,128], index: 2, kind: input, shape index: {}]   ;;  %s1568_s3 = inlined_call_operand.vmem [shape: bf16[128,128], index: 3, kind: input, shape index: {}]   ;;  %s1569_s4 = inlined_call_operand.vmem [shape: f32[300,2], index: 4, kind: output, shape index: {}]  }
   0x1 LB: > { %s1058_s16 = sadd.s32 4294967295, %s1326_s15   ;;  %p1062_p0 = scmp.ge.s32.totalorder %s1326_s15, 1  ;;  %s1326_s15 = sphi %s1354_s15, %s14_s15  }
   0x2   : > { %p163_p1 = scmp.lt.s32.totalorder %s1326_s15, 3 }
   0x4   : > { %p164_p2 = pnand %p1062_p0, %p163_p1 }
   0x5   : > { %v1232_v0 = vld [vmem:[%s1566_s1] sm:$0xff] (!%p164_p2)   ;;  %s189_s19 = smul.u32 (!%p164_p2), 19, %s1058_s16  ;;  %v1233_v1 = vld [vmem:[%s1566_s1 + $0x8] sm:$0xff] (!%p164_p2)   ;;  %v1234_v2 = vld [vmem:[%s1566_s1 + $0x10] sm:$0xff] (!%p164_p2)   ;;  %vm270_vm0 = vcmask (!%p164_p2), 523264   ;;  %vm982_vm2 = vcmask (!%p164_p2), 15360  }
   0x6   : > { %167 = sbr.rel (%p164_p2) target bundleno = 689 (0x2b1), region = 36  ;;  %1141 = vmatprep.subr.bf16.mxu0 (!%p164_p2), %v1232_v0  ;;  %v1236_v3 = vld [vmem:[%s1568_s3] sm:$0xff] (!%p164_p2)   ;;  %v1237_v4 = vld [vmem:[%s1568_s3 + $0x8] sm:$0xff] (!%p164_p2)   ;;  %v1235_v5 = vld [vmem:[%s1566_s1 + $0x18] sm:$0xff] (!%p164_p2)  }
   0x7   : > { %p190_p3 = scmp.lt.s32.totalorder (!%p164_p2), %s189_s19, 37  ;;  %1142 = vmatpush3.bf16.msra.mxu0 (!%p164_p2), %v1232_v0  ;;  %1205 = vmatprep.subr.bf16.mxu1 (!%p164_p2), %v1236_v3  ;;  %v1238_v11 = vld [vmem:[%s1568_s3 + $0x10] sm:$0xff] (!%p164_p2)   ;;  %v1239_v16 = vld [vmem:[%s1568_s3 + $0x18] sm:$0xff] (!%p164_p2)   ;;  %v1240_v19 = vld [vmem:[%s1568_s3 + $0x20] sm:$0xff] (!%p164_p2)  }
   0x8   : > { %1143 = vmatprep.subr.bf16.mxu0 (!%p164_p2), %v1233_v1  ;;  %1213 = vmatpush3.bf16.msra.mxu1 (!%p164_p2), %v1236_v3  ;;  %v1241_v24 = vld [vmem:[%s1568_s3 + $0x28] sm:$0xff] (!%p164_p2)   ;;  %v1242_v39 = vld [vmem:[%s1568_s3 + $0x30] sm:$0xff] (!%p164_p2)   ;;  %v1243_v40 = vld [vmem:[%s1568_s3 + $0x38] sm:$0xff] (!%p164_p2)  }
   0x9   : > { %1206 = vmatprep.subr.bf16.mxu1 (!%p164_p2), %v1237_v4  ;;  %v1440_v41 = vld [vmem:[%s1567_s2] ss:$0 sm:$0xff] (!%p164_p2) }
   0xb   : > { %1144 = vmatpush3.bf16.msra.mxu0 (!%p164_p2), %v1233_v1 }
   0xc   : > { %1145 = vmatprep.subr.bf16.mxu0 (!%p164_p2), %v1234_v2  ;;  %1214 = vmatpush3.bf16.msra.mxu1 (!%p164_p2), %v1237_v4 }
   0xd   : > { %s1571_s19 = smov (!%p190_p3, %s189_s19), 37  ;;  %1207 = vmatprep.subr.bf16.mxu1 %v1238_v11 }
   0xe   : > { %s1063_s26 = sshll.u32 %s1571_s19, 3 }
   0xf   : > { %s1385_s5 = scalar_lea.vmem %s1565_s0, %s1063_s26  ;;  %1146 = vmatpush3.bf16.msra.mxu0 %v1234_v2  ;;  %s1484_s27 = scalar_lea.vmem %s1569_s4, %s1063_s26 }
  0x10   : > { %v202_v6 = vld [vmem:[%s1385_s5] sm:$0xff]  ;;  %v203_v7 = vld [vmem:[%s1385_s5 + $0x8] sm:$0xff]  ;;  %v204_v9 = vld [vmem:[%s1385_s5 + $0x10] sm:$0xff]  ;;  %1147 = vmatprep.subr.bf16.mxu0 %v1235_v5  ;;  %1215 = vmatpush3.bf16.msra.mxu1 %v1238_v11 }
  0x11   : > { %v221_v8 = vpack.c.bf16 %v203_v7, %v202_v6  ;;  %v205_v10 = vld [vmem:[%s1385_s5 + $0x18] sm:$0xff]  ;;  %v206_v12 = vld [vmem:[%s1385_s5 + $0x20] sm:$0xff]  ;;  %v207_v13 = vld [vmem:[%s1385_s5 + $0x28] sm:$0xff]  ;;  %1208 = vmatprep.subr.bf16.mxu1 %v1239_v16 }
  0x12   : > { %v222_v14 = vpack.c.bf16 %v205_v10, %v204_v9  ;;  %v223_v15 = vpack.c.bf16 %v207_v13, %v206_v12  ;;  %v208_v17 = vld [vmem:[%s1385_s5 + $0x30] sm:$0xff]  ;;  %v209_v18 = vld [vmem:[%s1385_s5 + $0x38] sm:$0xff]  ;;  %v210_v20 = vld [vmem:[%s1385_s5 + $0x40] sm:$0xff] }
  0x13   : > { %1149 = vmatprep.mubr.msk.bf16.mxu0 %vm270_vm0, %v221_v8  ;;  %1148 = vmatpush3.bf16.msra.mxu0 %v1235_v5  ;;  %v211_v21 = vld [vmem:[%s1385_s5 + $0x48] sm:$0xff]  ;;  %v224_v22 = vpack.c.bf16 %v209_v18, %v208_v17  ;;  %v212_v25 = vld [vmem:[%s1385_s5 + $0x50] sm:$0xff]  ;;  %v213_v26 = vld [vmem:[%s1385_s5 + $0x58] sm:$0xff] }
  0x14   : > { %1169 = vmatprep.subr.bf16.mxu0 %v1236_v3  ;;  %1216 = vmatpush3.bf16.msra.mxu1 %v1239_v16  ;;  %v225_v23 = vpack.c.bf16 %v211_v21, %v210_v20  ;;  %v214_v27 = vld [vmem:[%s1385_s5 + $0x60] sm:$0xff]  ;;  %v215_v28 = vld [vmem:[%s1385_s5 + $0x68] sm:$0xff]  ;;  %v226_v29 = vpack.c.bf16 %v213_v26, %v212_v25  ;;  %v216_v31 = vld [vmem:[%s1385_s5 + $0x70] sm:$0xff] }
  0x15   : > { %1209 = vmatprep.subr.bf16.mxu1 %v1240_v19  ;;  %v227_v30 = vpack.c.bf16 %v215_v28, %v214_v27  ;;  %v217_v32 = vld [vmem:[%s1385_s5 + $0x78] sm:$0xff]  ;;  %v218_v33 = vld [vmem:[%s1385_s5 + $0x80] sm:$0xff]  ;;  %v219_v34 = vld [vmem:[%s1385_s5 + $0x88] sm:$0xff] }
  0x16   : > { %1150 = vmatmul.mubr.msk.bf16.vlgmr.msra.gmra.mrb[0].mxu0 %vm270_vm0, %v222_v14  ;;  %v228_v35 = vpack.c.bf16 %v217_v32, %v216_v31  ;;  %v229_v36 = vpack.c.bf16 %v219_v34, %v218_v33  ;;  %v220_v37 = vld [vmem:[%s1385_s5 + $0x90] sm:$0xff] }
  0x17   : > { %1153 = vmatprep.mubr.msk.bf16.mxu0 %vm270_vm0, %v223_v15  ;;  %1170 = vmatpush3.bf16.msra.mxu0 %v1236_v3  ;;  %v230_v38 = vpack.c.bf16 %v220_v37, %v220_v37 }
  0x18   : > { %1171 = vmatprep.subr.bf16.mxu0 %v1237_v4  ;;  %1217 = vmatpush3.bf16.msra.mxu1 %v1240_v19 }
  0x19   : > { %1210 = vmatprep.subr.bf16.mxu1 %v1241_v24 }
  0x1b   : > { %1172 = vmatpush3.bf16.msra.mxu0 %v1237_v4 }
  0x1c   : > { %1173 = vmatprep.subr.bf16.mxu0 %v1238_v11  ;;  %1218 = vmatpush3.bf16.msra.mxu1 %v1241_v24 }
  0x1d   : > { %1211 = vmatprep.subr.bf16.mxu1 %v1242_v39 }
  0x1e   : > { %1154 = vmatmul.mubr.msk.bf16.gmra.mrb[4].mxu0 %vm270_vm0, %v224_v22 }
  0x1f   : > { %1157 = vmatprep.mubr.msk.bf16.mxu0 %vm270_vm0, %v225_v23  ;;  %1174 = vmatpush3.bf16.msra.mxu0 %v1238_v11 }
  0x20   : > { %1175 = vmatprep.subr.bf16.mxu0 %v1239_v16  ;;  %1219 = vmatpush3.bf16.msra.mxu1 %v1242_v39 }
  0x21   : > { %1212 = vmatprep.subr.bf16.mxu1 %v1243_v40 }
  0x23   : > { %1176 = vmatpush3.bf16.msra.mxu0 %v1239_v16 }
  0x24   : > { %1177 = vmatprep.subr.bf16.mxu0 %v1240_v19  ;;  %1220 = vmatpush3.bf16.msra.mxu1 %v1243_v40 }
  0x26   : > { %1158 = vmatmul.mubr.msk.bf16.gmra.mrb[8].mxu0 %vm270_vm0, %v226_v29 }
  0x27   : > { %1161 = vmatprep.mubr.msk.bf16.mxu0 %vm270_vm0, %v227_v30  ;;  %1178 = vmatpush3.bf16.msra.mxu0 %v1240_v19 }
  0x28   : > { %1179 = vmatprep.subr.bf16.mxu0 %v1241_v24 }
  0x2b   : > { %1180 = vmatpush3.bf16.msra.mxu0 %v1241_v24 }
  0x2c   : > { %1181 = vmatprep.subr.bf16.mxu0 %v1242_v39 }
  0x2e   : > { %1162 = vmatmul.mubr.msk.bf16.gmra.mrb[12].mxu0 %vm270_vm0, %v228_v35 }
  0x2f   : > { %1165 = vmatprep.mubr.msk.bf16.mxu0 %vm270_vm0, %v229_v36  ;;  %1182 = vmatpush3.bf16.msra.mxu0 %v1242_v39 }
  0x30   : > { %1183 = vmatprep.subr.bf16.mxu0 %v1243_v40 }
  0x33   : > { %1184 = vmatpush3.bf16.msra.mxu0 %v1243_v40 }
  0x36   : > { %1166 = vmatmul.mubr.msk.bf16.gmra.mrb[16].mxu0 %vm270_vm0, %v230_v38 }
  0xe9   : > { %v1151_v42 = vpop.f32.mrb[0].mxu0 }
  0xea   : > { %v344_v43 = vadd.f32 %v1151_v42, %v1440_v41  ;;  %v335_v44 = vpop.f32.mrb[1].mxu0 }
  0xeb   : > { %v336_v45 = vadd.f32 %v1440_v41, %v335_v44  ;;  %v1152_v46 = vpop.f32.mrb[2].mxu0 }
  0xec   : > { %v347_v47 = vadd.f32 %v1152_v46, %v1440_v41  ;;  %v338_v48 = vpop.f32.mrb[3].mxu0  ;;  %v415_v50 = vmax.f32 %v344_v43, 0.0 }
  0xed   : > { %v339_v49 = vadd.f32 %v1440_v41, %v338_v48  ;;  %v413_v52 = vmax.f32 %v336_v45, 0.0 }
  0xee   : > { %v416_v51 = vmax.f32 %v347_v47, 0.0  ;;  %v1328_v47 = vmov 0  }
  0xef   : > { %v414_v53 = vmax.f32 %v339_v49, 0.0  ;;  %1230 = vset.pattern.permute.xlu1 %v1328_v47  ;;  %1231 = vset.pattern.permute.xlu0 %v1328_v47 }
  0xf0   : > { %v433_v54 = vpack.c.bf16 %v416_v51, %v415_v50 }
  0xf1   : > { %v432_v55 = vpack.c.bf16 %v414_v53, %v413_v52  ;;  %v1155_v56 = vpop.f32.mrb[4].mxu0 }
  0xf2   : > { %v360_v57 = vadd.f32 %v1155_v56, %v1440_v41  ;;  %v351_v58 = vpop.f32.mrb[5].mxu0 }
  0xf3   : > { %v352_v59 = vadd.f32 %v1440_v41, %v351_v58  ;;  %v1156_v60 = vpop.f32.mrb[6].mxu0  ;;  %1185 = vmatprep.mubr.bf16.mxu0 %v432_v55 }
  0xf4   : > { %v419_v61 = vmax.f32 %v360_v57, 0.0  ;;  %v363_v62 = vadd.f32 %v1156_v60, %v1440_v41  ;;  %v354_v63 = vpop.f32.mrb[7].mxu0  ;;  %1186 = vmatmul.mubr.bf16.vlgmr.msra.gmra.mrb[20].mxu0 %v433_v54 }
  0xf5   : > { %v417_v0 = vmax.f32 %v352_v59, 0.0  ;;  %v355_v1 = vadd.f32 %v1440_v41, %v354_v63 }
  0xf6   : > { %v420_v2 = vmax.f32 %v363_v62, 0.0 }
  0xf7   : > { %v418_v3 = vmax.f32 %v355_v1, 0.0 }
  0xf8   : > { %v435_v4 = vpack.c.bf16 %v420_v2, %v419_v61 }
  0xf9   : > { %v434_v5 = vpack.c.bf16 %v418_v3, %v417_v0  ;;  %v1159_v6 = vpop.f32.mrb[8].mxu0 }
  0xfa   : > { %v376_v7 = vadd.f32 %v1159_v6, %v1440_v41  ;;  %v367_v8 = vpop.f32.mrb[9].mxu0 }
  0xfb   : > { %1189 = vmatprep.mubr.bf16.mxu1 %v434_v5  ;;  %v368_v9 = vadd.f32 %v1440_v41, %v367_v8  ;;  %v1160_v10 = vpop.f32.mrb[10].mxu0 }
  0xfc   : > { %1190 = vmatmul.mubr.bf16.vlgmr.msra.gmra.mrb[0].mxu1 %v435_v4  ;;  %v423_v11 = vmax.f32 %v376_v7, 0.0  ;;  %v379_v12 = vadd.f32 %v1160_v10, %v1440_v41  ;;  %v370_v13 = vpop.f32.mrb[11].mxu0 }
  0xfd   : > { %v421_v14 = vmax.f32 %v368_v9, 0.0  ;;  %v371_v15 = vadd.f32 %v1440_v41, %v370_v13 }
  0xfe   : > { %v424_v16 = vmax.f32 %v379_v12, 0.0 }
  0xff   : > { %v422_v17 = vmax.f32 %v371_v15, 0.0 }
 0x100   : > { %v437_v18 = vpack.c.bf16 %v424_v16, %v423_v11 }
 0x101   : > { %v436_v19 = vpack.c.bf16 %v422_v17, %v421_v14  ;;  %v1163_v20 = vpop.f32.mrb[12].mxu0 }
 0x102   : > { %v392_v21 = vadd.f32 %v1163_v20, %v1440_v41  ;;  %v383_v22 = vpop.f32.mrb[13].mxu0 }
 0x103   : > { %1193 = vmatprep.mubr.bf16.mxu1 %v436_v19  ;;  %v384_v23 = vadd.f32 %v1440_v41, %v383_v22  ;;  %v1164_v24 = vpop.f32.mrb[14].mxu0 }
 0x104   : > { %1194 = vmatmul.mubr.bf16.gmra.mrb[4].mxu1 %v437_v18  ;;  %v427_v25 = vmax.f32 %v392_v21, 0.0  ;;  %v395_v26 = vadd.f32 %v1164_v24, %v1440_v41  ;;  %v386_v27 = vpop.f32.mrb[15].mxu0 }
 0x105   : > { %v425_v28 = vmax.f32 %v384_v23, 0.0  ;;  %v387_v29 = vadd.f32 %v1440_v41, %v386_v27 }
 0x106   : > { %v428_v30 = vmax.f32 %v395_v26, 0.0 }
 0x107   : > { %v426_v31 = vmax.f32 %v387_v29, 0.0 }
 0x108   : > { %v439_v32 = vpack.c.bf16 %v428_v30, %v427_v25 }
 0x109   : > { %v438_v33 = vpack.c.bf16 %v426_v31, %v425_v28  ;;  %v1167_v34 = vpop.f32.mrb[16].mxu0 }
 0x10a   : > { %v408_v35 = vadd.f32 %v1167_v34, %v1440_v41  ;;  %v399_v36 = vpop.f32.mrb[17].mxu0 }
 0x10b   : > { %1197 = vmatprep.mubr.bf16.mxu1 %v438_v33  ;;  %v400_v37 = vadd.f32 %v1440_v41, %v399_v36  ;;  %v1168_v38 = vpop.f32.mrb[18].mxu0 }
 0x10c   : > { %1198 = vmatmul.mubr.bf16.gmra.mrb[8].mxu1 %v439_v32  ;;  %v431_v39 = vmax.f32 %v408_v35, 0.0  ;;  %v402_v40 = vpop.f32.mrb[19].mxu0 }
 0x10d   : > { %v429_v42 = vmax.f32 %v400_v37, 0.0  ;;  %v403_v43 = vadd.f32 %v1440_v41, %v402_v40 }
 0x10e   : > { %v441_v45 = vpack.c.bf16 %v431_v39, %v431_v39 }
 0x10f   : > { %v430_v44 = vmax.f32 %v403_v43, 0.0 }
 0x111   : > { %v440_v46 = vpack.c.bf16 %v430_v44, %v429_v42 }
 0x113   : > { %1201 = vmatprep.mubr.bf16.mxu1 %v440_v46 }
 0x114   : > { %1202 = vmatmul.mubr.bf16.gmra.mrb[12].mxu1 %v441_v45 }
 0x1c7   : > { %v1187_v48 = vpop.f32.mrb[20].mxu0 }
 0x1c8   : > { %v1090_v49 = vclamps-f32 %v1187_v48, 60.0  ;;  %v540_v50 = vpop.f32.mrb[21].mxu0 }
 0x1c9   : > { %v1088_v51 = vclamps-f32 %v540_v50, 60.0  ;;  %v1188_v52 = vpop.f32.mrb[22].mxu0 }
 0x1ca   : > { %v658_v53 = vsub.f32 0.0, %v1090_v49  ;;  %v1091_v54 = vclamps-f32 %v1188_v52, 60.0  ;;  %v543_v55 = vpop.f32.mrb[23].mxu0 }
 0x1cb   : > { %v656_v56 = vsub.f32 0.0, %v1088_v51  ;;  %v1089_v57 = vclamps-f32 %v543_v55, 60.0 }
 0x1cc   : > { %v679_v58 = vmul.f32 1.442695, %v658_v53  ;;  %v659_v41 = vsub.f32 0.0, %v1091_v54 }
 0x1cd   : > { %v675_v59 = vmul.f32 1.442695, %v656_v56  ;;  %v657_v60 = vsub.f32 0.0, %v1089_v57 }
 0x1ce   : > { %1244 = vpow2.f32 %v679_v58  ;;  %v681_v61 = vmul.f32 1.442695, %v659_v41 }
 0x1cf   : > { %1246 = vpow2.f32 %v675_v59  ;;  %v677_v62 = vmul.f32 1.442695, %v657_v60  ;;  %v1191_v63 = vpop.f32.mrb[0].mxu1 }
 0x1d0   : > { %1248 = vpow2.f32 %v681_v61  ;;  %v1094_v0 = vclamps-f32 %v1191_v63, 60.0  ;;  %v556_v1 = vpop.f32.mrb[1].mxu1 }
 0x1d1   : > { %1250 = vpow2.f32 %v677_v62  ;;  %v1192_v2 = vpop.f32.mrb[2].mxu1  ;;  %v1092_v4 = vclamps-f32 %v556_v1, 60.0 }
 0x1d2   : > { %v662_v3 = vsub.f32 0.0, %v1094_v0  ;;  %v1095_v5 = vclamps-f32 %v1192_v2, 60.0  ;;  %v559_v6 = vpop.f32.mrb[3].mxu1 }
 0x1d3   : > { %v660_v9 = vsub.f32 0.0, %v1092_v4  ;;  %v1093_v11 = vclamps-f32 %v559_v6, 60.0 }
 0x1d4   : > { %v663_v7 = vsub.f32 0.0, %v1095_v5  ;;  %v687_v8 = vmul.f32 1.442695, %v662_v3 }
 0x1d5   : > { %v683_v20 = vmul.f32 1.442695, %v660_v9  ;;  %v661_v21 = vsub.f32 0.0, %v1093_v11 }
 0x1d6   : > { %v689_v10 = vmul.f32 1.442695, %v663_v7  ;;  %1252 = vpow2.f32 %v687_v8 }
 0x1d7   : > { %v1195_v12 = vpop.f32.mrb[4].mxu1  ;;  %v685_v28 = vmul.f32 1.442695, %v661_v21 }
 0x1d8   : > { %v1245_v13 = vpop.eup %1244  ;;  %v572_v14 = vpop.f32.mrb[5].mxu1  ;;  %1254 = vpow2.f32 %v689_v10  ;;  %v1098_v26 = vclamps-f32 %v1195_v12, 60.0 }
 0x1d9   : > { %v1247_v15 = vpop.eup %1246  ;;  %v715_v16 = vadd.f32 1.0, %v1245_v13  ;;  %v1196_v17 = vpop.f32.mrb[6].mxu1  ;;  %v1096_v36 = vclamps-f32 %v572_v14, 60.0 }
 0x1da   : > { %v1249_v18 = vpop.eup %1248  ;;  %v713_v19 = vadd.f32 1.0, %v1247_v15  ;;  %v575_v22 = vpop.f32.mrb[7].mxu1  ;;  %v1099_v27 = vclamps-f32 %v1196_v17, 60.0  ;;  %v666_v30 = vsub.f32 0.0, %v1098_v26 }
 0x1db   : > { %v1251_v23 = vpop.eup %1250  ;;  %1256 = vrcp.f32 %v715_v16  ;;  %v716_v24 = vadd.f32 1.0, %v1249_v18  ;;  %v1097_v44 = vclamps-f32 %v575_v22, 60.0  ;;  %v664_v46 = vsub.f32 0.0, %v1096_v36 }
 0x1dc   : > { %1258 = vrcp.f32 %v713_v19  ;;  %v714_v25 = vadd.f32 1.0, %v1251_v23  ;;  %v667_v32 = vsub.f32 0.0, %v1099_v27  ;;  %v695_v38 = vmul.f32 1.442695, %v666_v30 }
 0x1dd   : > { %1260 = vpow2.f32 %v683_v20  ;;  %v665_v53 = vsub.f32 0.0, %v1097_v44  ;;  %v691_v55 = vmul.f32 1.442695, %v664_v46 }
 0x1de   : > { %1262 = vrcp.f32 %v716_v24  ;;  %v697_v40 = vmul.f32 1.442695, %v667_v32 }
 0x1df   : > { %v1199_v29 = vpop.f32.mrb[8].mxu1  ;;  %1264 = vrcp.f32 %v714_v25  ;;  %v693_v61 = vmul.f32 1.442695, %v665_v53 }
 0x1e0   : > { %v1461_v31 = vpop.f32.mrb[9].mxu1  ;;  %1266 = vpow2.f32 %v685_v28  ;;  %v1253_v35 = vpop.eup %1252  ;;  %v1102_v41 = vclamps-f32 %v1199_v29, 60.0 }
 0x1e1   : > { %v1200_v33 = vpop.f32.mrb[10].mxu1  ;;  %v719_v43 = vadd.f32 1.0, %v1253_v35  ;;  %1268 = vpow2.f32 %v695_v38  ;;  %v1100_v5 = vclamps-f32 %v1461_v31, 60.0 }
 0x1e2   : > { %v1463_v34 = vpop.f32.mrb[11].mxu1  ;;  %v1255_v37 = vpop.eup %1254  ;;  %1270 = vpow2.f32 %v697_v40  ;;  %v1103_v60 = vclamps-f32 %v1200_v33, 60.0  ;;  %v670_v63 = vsub.f32 0.0, %v1102_v41 }
 0x1e3   : > { %v720_v45 = vadd.f32 1.0, %v1255_v37  ;;  %1272 = vrcp.f32 %v719_v43  ;;  %v1101_v11 = vclamps-f32 %v1463_v34, 60.0  ;;  %v668_v13 = vsub.f32 0.0, %v1100_v5 }
 0x1e4   : > { %v671_v1 = vsub.f32 0.0, %v1103_v60  ;;  %v703_v7 = vmul.f32 1.442695, %v670_v63 }
 0x1e5   : > { %v1257_v39 = vpop.eup %1256  ;;  %1274 = vrcp.f32 %v720_v45  ;;  %v669_v17 = vsub.f32 0.0, %v1101_v11  ;;  %v699_v18 = vmul.f32 1.442695, %v668_v13 }
 0x1e6   : > { %v1259_v42 = vpop.eup %1258  ;;  %785 = vperm.xlu1 %1230, %v1257_v39   ;;  %v756_v58 = vsub.f32 1.0, %v1257_v39  ;;  %1276 = vpow2.f32 %v691_v55  ;;  %v705_v9 = vmul.f32 1.442695, %v671_v1 }
 0x1e7   : > { %775 = vperm.xlu0 %1231, %v1259_v42   ;;  %v1465_v47 = vpop.f32.mrb[12].mxu1  ;;  %v1261_v48 = vpop.eup %1260  ;;  %v754_v0 = vsub.f32 1.0, %v1259_v42  ;;  %v701_v26 = vmul.f32 1.442695, %v669_v17 }
 0x1e8   : > { %v1467_v49 = vpop.f32.mrb[13].mxu1  ;;  %v1263_v50 = vpop.eup %1262  ;;  %v717_v57 = vadd.f32 1.0, %v1261_v48  ;;  %v1106_v19 = vclamps-f32 %v1465_v47, 60.0 }
 0x1e9   : > { %v1204_v51 = vpop.f32.mrb[14].mxu1  ;;  %v1265_v52 = vpop.eup %1264  ;;  %v757_v59 = vsub.f32 1.0, %v1263_v50  ;;  %v1104_v22 = vclamps-f32 %v1467_v49, 60.0 }
 0x1ea   : > { %790 = vperm.xlu1 %1230, %v1263_v50   ;;  %v1469_v54 = vpop.f32.mrb[15].mxu1  ;;  %v1267_v56 = vpop.eup %1266  ;;  %1278 = vrcp.f32 %v717_v57  ;;  %v755_v2 = vsub.f32 1.0, %v1265_v52  ;;  %v674_v28 = vsub.f32 0.0, %v1106_v19 }
 0x1eb   : > { %780 = vperm.xlu0 %1231, %v1265_v52   ;;  %v718_v62 = vadd.f32 1.0, %v1267_v56  ;;  %v1269_v3 = vpop.eup %1268  ;;  %1280 = vpow2.f32 %v693_v61  ;;  %v1105_v25 = vclamps-f32 %v1469_v54, 60.0  ;;  %v672_v29 = vsub.f32 0.0, %v1104_v22 }
 0x1ec   : > { %v1271_v4 = vpop.eup %1270  ;;  %v723_v10 = vadd.f32 1.0, %v1269_v3  ;;  %v711_v35 = vmul.f32 1.442695, %v674_v28 }
 0x1ed   : > { %1282 = vrcp.f32 %v718_v62  ;;  %v1273_v6 = vpop.eup %1272  ;;  %v724_v12 = vadd.f32 1.0, %v1271_v4  ;;  %v673_v31 = vsub.f32 0.0, %v1105_v25  ;;  %v707_v37 = vmul.f32 1.442695, %v672_v29 }
 0x1ee   : > { %880 = vperm.xlu1 %1230, %v756_v58   ;;  %1284 = vpow2.f32 %v703_v7  ;;  %v760_v14 = vsub.f32 1.0, %v1273_v6 }
 0x1ef   : > { %885 = vperm.xlu0 %1231, %v757_v59   ;;  %v1275_v8 = vpop.eup %1274  ;;  %1286 = vpow2.f32 %v705_v9  ;;  %v709_v39 = vmul.f32 1.442695, %v673_v31 }
 0x1f0   : > { %v1277_v15 = vpop.eup %1276  ;;  %1288 = vrcp.f32 %v723_v10  ;;  %v761_v24 = vsub.f32 1.0, %v1275_v8 }
 0x1f1   : > { %1290 = vrcp.f32 %v724_v12  ;;  %v721_v21 = vadd.f32 1.0, %v1277_v15 }
 0x1f2   : > { %870 = vperm.xlu1 %1230, %v754_v0   ;;  %1292 = vpow2.f32 %v699_v18 }
 0x1f3   : > { %875 = vperm.xlu0 %1231, %v755_v2   ;;  %1294 = vrcp.f32 %v721_v21 }
 0x1f4   : > { %v1279_v16 = vpop.eup %1278  ;;  %1296 = vpow2.f32 %v701_v26 }
 0x1f5   : > { %v1281_v20 = vpop.eup %1280  ;;  %v758_v30 = vsub.f32 1.0, %v1279_v16 }
 0x1f6   : > { %810 = vperm.xlu1 %1230, %v1275_v8   ;;  %v722_v27 = vadd.f32 1.0, %v1281_v20  ;;  %v751_v8 = vlaneseq }
 0x1f7   : > { %805 = vperm.xlu0 %1231, %v1273_v6   ;;  %v1283_v23 = vpop.eup %1282 }
 0x1f8   : > { %v759_v32 = vsub.f32 1.0, %v1283_v23  ;;  %v1285_v33 = vpop.eup %1284  ;;  %1298 = vrcp.f32 %v722_v27  ;;  %v1476_v11 = vand.u32 127, %v751_v8 }
 0x1f9   : > { %v1287_v34 = vpop.eup %1286  ;;  %v727_v40 = vadd.f32 1.0, %v1285_v33  ;;  %1300 = vpow2.f32 %v711_v35 }
 0x1fa   : > { %900 = vperm.xlu1 %1230, %v760_v14   ;;  %v1289_v36 = vpop.eup %1288  ;;  %v728_v42 = vadd.f32 1.0, %v1287_v34  ;;  %1302 = vpow2.f32 %v707_v37  ;;  %vm753_vm1 = vcmp.eq.s32.totalorder %v1476_v11, 0 }
 0x1fb   : > { %795 = vperm.xlu0 %1231, %v1279_v16   ;;  %v1291_v38 = vpop.eup %1290  ;;  %v764_v43 = vsub.f32 1.0, %v1289_v36  ;;  %1304 = vpow2.f32 %v709_v39 }
 0x1fc   : > { %v1293_v44 = vpop.eup %1292  ;;  %1306 = vrcp.f32 %v727_v40  ;;  %v765_v49 = vsub.f32 1.0, %v1291_v38 }
 0x1fd   : > { %v1295_v45 = vpop.eup %1294  ;;  %1308 = vrcp.f32 %v728_v42  ;;  %v725_v47 = vadd.f32 1.0, %v1293_v44 }
 0x1fe   : > { %800 = vperm.xlu1 %1230, %v1283_v23   ;;  %v1297_v46 = vpop.eup %1296  ;;  %v762_v51 = vsub.f32 1.0, %v1295_v45 }
 0x1ff   : > { %905 = vperm.xlu0 %1231, %v761_v24   ;;  %v726_v50 = vadd.f32 1.0, %v1297_v46  ;;  %1310 = vrcp.f32 %v725_v47 }
 0x201   : > { %1312 = vrcp.f32 %v726_v50 }
 0x202   : > { %890 = vperm.xlu1 %1230, %v758_v30   ;;  %v1299_v48 = vpop.eup %1298 }
 0x203   : > { %895 = vperm.xlu0 %1231, %v759_v32   ;;  %v1301_v52 = vpop.eup %1300  ;;  %v763_v53 = vsub.f32 1.0, %v1299_v48 }
 0x204   : > { %v1303_v54 = vpop.eup %1302  ;;  %v731_v59 = vadd.f32 1.0, %v1301_v52 }
 0x205   : > { %v1305_v55 = vpop.eup %1304  ;;  %v729_v58 = vadd.f32 1.0, %v1303_v54 }
 0x206   : > { %830 = vperm.xlu1 %1230, %v1291_v38   ;;  %v1307_v56 = vpop.eup %1306  ;;  %v730_v41 = vadd.f32 1.0, %v1305_v55 }
 0x207   : > { %825 = vperm.xlu0 %1231, %v1289_v36   ;;  %v1309_v57 = vpop.eup %1308  ;;  %v768_v60 = vsub.f32 1.0, %v1307_v56  ;;  %1314 = vrcp.f32 %v729_v58 }
 0x208   : > { %1316 = vrcp.f32 %v730_v41  ;;  %v769_v63 = vsub.f32 1.0, %v1309_v57 }
 0x209   : > { %v1311_v61 = vpop.eup %1310  ;;  %1318 = vrcp.f32 %v731_v59 }
 0x20a   : > { %920 = vperm.xlu1 %1230, %v764_v43   ;;  %v766_v0 = vsub.f32 1.0, %v1311_v61 }
 0x20b   : > { %815 = vperm.xlu0 %1231, %v1295_v45   ;;  %v1313_v62 = vpop.eup %1312 }
 0x20c   : > { %v767_v1 = vsub.f32 1.0, %v1313_v62 }
 0x20e   : > { %820 = vperm.xlu1 %1230, %v1299_v48  }
 0x20f   : > { %925 = vperm.xlu0 %1231, %v765_v49  }
 0x211   : > { %v1315_v2 = vpop.eup %1314 }
 0x212   : > { %910 = vperm.xlu1 %1230, %v762_v51   ;;  %v1317_v3 = vpop.eup %1316  ;;  %v770_v5 = vsub.f32 1.0, %v1315_v2 }
 0x213   : > { %915 = vperm.xlu0 %1231, %v763_v53   ;;  %v1319_v4 = vpop.eup %1318  ;;  %v771_v7 = vsub.f32 1.0, %v1317_v3 }
 0x214   : > { %v772_v6 = vsub.f32 1.0, %v1319_v4 }
 0x216   : > { %850 = vperm.xlu1 %1230, %v1309_v57  }
 0x217   : > { %845 = vperm.xlu0 %1231, %v1307_v56  }
 0x21a   : > { %940 = vperm.xlu1 %1230, %v768_v60  }
 0x21b   : > { %835 = vperm.xlu0 %1231, %v1311_v61  }
 0x21e   : > { %840 = vperm.xlu1 %1230, %v1313_v62  }
 0x21f   : > { %945 = vperm.xlu0 %1231, %v769_v63  }
 0x222   : > { %930 = vperm.xlu1 %1230, %v766_v0  }
 0x223   : > { %935 = vperm.xlu0 %1231, %v767_v1  }
 0x226   : > { %860 = vperm.xlu1 %1230, %v1317_v3  }
 0x227   : > { %865 = vperm.xlu0 %1231, %v1319_v4  }
 0x22a   : > { %950 = vperm.xlu1 %1230, %v770_v5  }
 0x22b   : > { %855 = vperm.xlu0 %1231, %v1315_v2  }
 0x22e   : > { %960 = vperm.xlu1 %1230, %v772_v6  }
 0x22f   : > { %955 = vperm.xlu0 %1231, %v771_v7  }
 0x265   : > { %v786_v9 = vpop.permute.xlu1 %785 }
 0x266   : > { %v776_v10 = vpop.permute.xlu0 %775 }
 0x269   : > { %v791_v12 = vpop.permute.xlu1 %790 }
 0x26a   : > { %v781_v13 = vpop.permute.xlu0 %780 }
 0x26d   : > { %v881_v14 = vpop.permute.xlu1 %880 }
 0x26e   : > { %v965_v15 = vsel %vm753_vm1, %v786_v9, %v881_v14  ;;  %v886_v16 = vpop.permute.xlu0 %885 }
 0x26f   : > { %985 = vst.msk [vmem:[%s1484_s27 + $0x10] sm:$0xff] %vm982_vm2, %v965_v15  ;;  %v966_v17 = vsel %vm753_vm1, %v791_v12, %v886_v16 }
 0x270   : > { %986 = vst.msk [vmem:[%s1484_s27 + $0x18] sm:$0xff] %vm982_vm2, %v966_v17 }
 0x271   : > { %v871_v18 = vpop.permute.xlu1 %870 }
 0x272   : > { %v963_v19 = vsel %vm753_vm1, %v776_v10, %v871_v18  ;;  %v876_v20 = vpop.permute.xlu0 %875 }
 0x273   : > { %983 = vst.msk [vmem:[%s1484_s27] sm:$0xff] %vm982_vm2, %v963_v19  ;;  %v964_v21 = vsel %vm753_vm1, %v781_v13, %v876_v20 }
 0x274   : > { %984 = vst.msk [vmem:[%s1484_s27 + $0x8] sm:$0xff] %vm982_vm2, %v964_v21 }
 0x275   : > { %v811_v22 = vpop.permute.xlu1 %810 }
 0x276   : > { %v806_v23 = vpop.permute.xlu0 %805 }
 0x279   : > { %v901_v24 = vpop.permute.xlu1 %900 }
 0x27a   : > { %v969_v25 = vsel %vm753_vm1, %v806_v23, %v901_v24  ;;  %v796_v26 = vpop.permute.xlu0 %795 }
 0x27b   : > { %989 = vst.msk [vmem:[%s1484_s27 + $0x30] sm:$0xff] %vm982_vm2, %v969_v25 }
 0x27d   : > { %v801_v27 = vpop.permute.xlu1 %800 }
 0x27e   : > { %v906_v28 = vpop.permute.xlu0 %905 }
 0x27f   : > { %v970_v29 = vsel %vm753_vm1, %v811_v22, %v906_v28 }
 0x280   : > { %990 = vst.msk [vmem:[%s1484_s27 + $0x38] sm:$0xff] %vm982_vm2, %v970_v29 }
 0x281   : > { %v891_v30 = vpop.permute.xlu1 %890 }
 0x282   : > { %v967_v31 = vsel %vm753_vm1, %v796_v26, %v891_v30  ;;  %v896_v32 = vpop.permute.xlu0 %895 }
 0x283   : > { %987 = vst.msk [vmem:[%s1484_s27 + $0x20] sm:$0xff] %vm982_vm2, %v967_v31  ;;  %v968_v33 = vsel %vm753_vm1, %v801_v27, %v896_v32 }
 0x284   : > { %988 = vst.msk [vmem:[%s1484_s27 + $0x28] sm:$0xff] %vm982_vm2, %v968_v33 }
 0x285   : > { %v831_v34 = vpop.permute.xlu1 %830 }
 0x286   : > { %v826_v35 = vpop.permute.xlu0 %825 }
 0x289   : > { %v921_v36 = vpop.permute.xlu1 %920 }
 0x28a   : > { %v973_v37 = vsel %vm753_vm1, %v826_v35, %v921_v36  ;;  %v816_v38 = vpop.permute.xlu0 %815 }
 0x28b   : > { %993 = vst.msk [vmem:[%s1484_s27 + $0x50] sm:$0xff] %vm982_vm2, %v973_v37 }
 0x28d   : > { %v821_v39 = vpop.permute.xlu1 %820 }
 0x28e   : > { %v926_v40 = vpop.permute.xlu0 %925 }
 0x28f   : > { %v974_v42 = vsel %vm753_vm1, %v831_v34, %v926_v40 }
 0x290   : > { %994 = vst.msk [vmem:[%s1484_s27 + $0x58] sm:$0xff] %vm982_vm2, %v974_v42 }
 0x291   : > { %v911_v43 = vpop.permute.xlu1 %910 }
 0x292   : > { %v971_v44 = vsel %vm753_vm1, %v816_v38, %v911_v43  ;;  %v916_v45 = vpop.permute.xlu0 %915 }
 0x293   : > { %991 = vst.msk [vmem:[%s1484_s27 + $0x40] sm:$0xff] %vm982_vm2, %v971_v44  ;;  %v972_v46 = vsel %vm753_vm1, %v821_v39, %v916_v45 }
 0x294   : > { %992 = vst.msk [vmem:[%s1484_s27 + $0x48] sm:$0xff] %vm982_vm2, %v972_v46 }
 0x295   : > { %v851_v47 = vpop.permute.xlu1 %850 }
 0x296   : > { %v846_v48 = vpop.permute.xlu0 %845 }
 0x299   : > { %v941_v49 = vpop.permute.xlu1 %940 }
 0x29a   : > { %v977_v50 = vsel %vm753_vm1, %v846_v48, %v941_v49  ;;  %v836_v51 = vpop.permute.xlu0 %835 }
 0x29b   : > { %997 = vst.msk [vmem:[%s1484_s27 + $0x70] sm:$0xff] %vm982_vm2, %v977_v50 }
 0x29d   : > { %v841_v52 = vpop.permute.xlu1 %840 }
 0x29e   : > { %v946_v53 = vpop.permute.xlu0 %945 }
 0x29f   : > { %v978_v54 = vsel %vm753_vm1, %v851_v47, %v946_v53 }
 0x2a0   : > { %998 = vst.msk [vmem:[%s1484_s27 + $0x78] sm:$0xff] %vm982_vm2, %v978_v54 }
 0x2a1   : > { %v931_v55 = vpop.permute.xlu1 %930 }
 0x2a2   : > { %v975_v56 = vsel %vm753_vm1, %v836_v51, %v931_v55  ;;  %v936_v57 = vpop.permute.xlu0 %935 }
 0x2a3   : > { %995 = vst.msk [vmem:[%s1484_s27 + $0x60] sm:$0xff] %vm982_vm2, %v975_v56  ;;  %v976_v58 = vsel %vm753_vm1, %v841_v52, %v936_v57 }
 0x2a4   : > { %996 = vst.msk [vmem:[%s1484_s27 + $0x68] sm:$0xff] %vm982_vm2, %v976_v58 }
 0x2a5   : > { %v861_v41 = vpop.permute.xlu1 %860 }
 0x2a6   : > { %v866_v59 = vpop.permute.xlu0 %865 }
 0x2a9   : > { %v951_v60 = vpop.permute.xlu1 %950 }
 0x2aa   : > { %v856_v61 = vpop.permute.xlu0 %855 }
 0x2ab   : > { %v979_v62 = vsel %vm753_vm1, %v856_v61, %v951_v60 }
 0x2ac   : > { %999 = vst.msk [vmem:[%s1484_s27 + $0x80] sm:$0xff] %vm982_vm2, %v979_v62 }
 0x2ad   : > { %v961_v63 = vpop.permute.xlu1 %960 }
 0x2ae   : > { %v981_v0 = vsel %vm753_vm1, %v866_v59, %v961_v63  ;;  %v956_v1 = vpop.permute.xlu0 %955 }
 0x2af   : > { %1001 = vst.msk [vmem:[%s1484_s27 + $0x90] sm:$0xff] %vm982_vm2, %v981_v0  ;;  %v980_v2 = vsel %vm753_vm1, %v861_v41, %v956_v1 }
 0x2b0   : > { %1000 = vst.msk [vmem:[%s1484_s27 + $0x88] sm:$0xff] %vm982_vm2, %v980_v2 }
 0x2b1 PF: > { %s14_s15 = sadd.s32 1, %s1326_s15  }
 0x2b2   : > { %p11_p4 = scmp.ge.s32.totalorder %s14_s15, 4  }
 0x2b4   :  { %13 = sbr.rel (!%p11_p4) target bundleno = 1 (0x1), region = 66 }

</bundles_post_ra>
